<compile_context>
chip_gen: v7x
topology: tpu7x:2x2x1
jax: 0.10.0
libtpu: 0.0.40
codegen_flags: <defaults>
</compile_context>

<pallas_src>
import jax
import jax.numpy as jnp
from jax.experimental import pallas as pl
from jax.experimental.pallas import tpu as pltpu

_SUBLANE = 8


def _mlp_softmax_kernel(x_ref, w1_ref, b1_ref, w2_ref, b2_ref, w3_ref, b3_ref, o_ref):
    # x tile: (tb, in_size) f32 in HBM/VMEM; cast to bf16 in-kernel for the MXU.
    x = x_ref[...].astype(jnp.bfloat16)

    # fc1 + ReLU  (bf16 MXU inputs, f32 accumulation, f32 VPU elementwise)
    h1 = jnp.dot(x, w1_ref[...], preferred_element_type=jnp.float32) + b1_ref[...]
    h1 = jnp.maximum(h1, 0.0)

    # fc2 + ReLU
    h2 = jnp.dot(h1.astype(jnp.bfloat16), w2_ref[...],
                 preferred_element_type=jnp.float32) + b2_ref[...]
    h2 = jnp.maximum(h2, 0.0)

    # fc3 -> softmax over the real out_size classes only (no padded lanes).
    logits = jnp.dot(h2.astype(jnp.bfloat16), w3_ref[...],
                     preferred_element_type=jnp.float32) + b3_ref[...]
    m = jnp.max(logits, axis=-1, keepdims=True)
    e = jnp.exp(logits - m)
    denom = jnp.sum(e, axis=-1, keepdims=True)
    # Exact divide: rows sum to 1 within f32 rounding (approx reciprocal was too coarse).
    o_ref[...] = (e / denom).astype(o_ref.dtype)


def _round_up(n, m):
    return ((n + m - 1) // m) * m


def _pick_tile(batch, block_batch):
    """Batch-tile size: multiple of 8 (sublanes), prefer multiple of 16 (bf16 packing),
    capped at ceil(batch/2) so the grid has >=2 steps for megacore sharding when possible."""
    block_batch = _round_up(max(block_batch, _SUBLANE), _SUBLANE)
    half = -(-batch // 2)                              # ceil(batch / 2)
    tb = min(block_batch, _round_up(half, 16))
    tb = min(tb, _round_up(batch, _SUBLANE))           # never (much) larger than the batch
    return max(_round_up(tb, _SUBLANE), _SUBLANE)


def small_policy_nn_forward(x, params, *, block_batch=2048):
    """x: [batch, in_size] float32. params: dict of w1,b1,w2,b2,w3,b3 (weights as (in, out))."""
    w1, b1 = params["w1"], params["b1"]
    w2, b2 = params["w2"], params["b2"]
    w3, b3 = params["w3"], params["b3"]

    batch, in_size = x.shape
    h1 = w1.shape[1]
    h2 = w2.shape[1]
    out_size = w3.shape[1]

    tb = _pick_tile(batch, block_batch)
    grid = (pl.cdiv(batch, tb),)                       # partial last block is masked by Pallas

    # Tiny weights: bf16 for the MXU (one-time cast, VMEM-resident). Biases stay f32.
    w1_bf = w1.astype(jnp.bfloat16)
    w2_bf = w2.astype(jnp.bfloat16)
    w3_bf = w3.astype(jnp.bfloat16)
    b1_f = b1.astype(jnp.float32)
    b2_f = b2.astype(jnp.float32)
    b3_f = b3.astype(jnp.float32)

    const_blk = lambda i: (0, 0)                       # weights/biases: resident across steps

    flops = 2 * batch * (in_size * h1 + h1 * h2 + h2 * out_size)
    bytes_accessed = (
        batch * in_size * 4 + batch * out_size * 4                  # f32 x in, compact f32 out
        + (in_size * h1 + h1 * h2 + h2 * out_size) * 2              # bf16 weights
        + (h1 + h2 + out_size) * 4                                  # f32 biases
    )
    cost = pl.CostEstimate(
        flops=flops,
        transcendentals=batch * out_size,
        bytes_accessed=bytes_accessed,
    )

    return pl.pallas_call(
        _mlp_softmax_kernel,
        out_shape=jax.ShapeDtypeStruct((batch, out_size), jnp.float32),
        grid=grid,
        in_specs=[
            pl.BlockSpec((tb, in_size), lambda i: (i, 0)),   # x: tiled along batch, pipelined
            pl.BlockSpec((in_size, h1), const_blk),
            pl.BlockSpec((1, h1), const_blk),
            pl.BlockSpec((h1, h2), const_blk),
            pl.BlockSpec((1, h2), const_blk),
            pl.BlockSpec((h2, out_size), const_blk),
            pl.BlockSpec((1, out_size), const_blk),
        ],
        out_specs=pl.BlockSpec((tb, out_size), lambda i: (i, 0)),
        compiler_params=pltpu.CompilerParams(
            dimension_semantics=("parallel",),   # batch tiles shard across v7x's 2 TCs
        ),
        cost_estimate=cost,
    )(x, w1_bf, b1_f, w2_bf, b2_f, w3_bf, b3_f)


def init_params(key, in_size, out_size, hidden_size=(64, 32)):
    """Deterministic init matching nn.Linear shapes (weights stored transposed: (in, out))."""
    h1, h2 = hidden_size
    ks = jax.random.split(key, 6)

    def uniform(k, shape, fan_in):
        bound = 1.0 / jnp.sqrt(jnp.float32(fan_in))
        return jax.random.uniform(k, shape, jnp.float32, -bound, bound)

    return {
        "w1": uniform(ks[0], (in_size, h1), in_size),
        "b1": uniform(ks[1], (1, h1), in_size),
        "w2": uniform(ks[2], (h1, h2), h1),
        "b2": uniform(ks[3], (1, h2), h1),
        "w3": uniform(ks[4], (h2, out_size), h2),
        "b3": uniform(ks[5], (1, out_size), h2),
    }


def _reference(x, params):
    h = jnp.maximum(x @ params["w1"] + params["b1"], 0.0)
    h = jnp.maximum(h @ params["w2"] + params["b2"], 0.0)
    return jax.nn.softmax(h @ params["w3"] + params["b3"], axis=-1)


if __name__ == "__main__":
    key = jax.random.PRNGKey(0)
    k_x, k_p = jax.random.split(key)

    batch, in_size, out_size = 8, 16, 4
    x = jax.random.normal(k_x, (batch, in_size), dtype=jnp.float32)
    params = init_params(k_p, in_size, out_size, hidden_size=(64, 32))

    out = jax.block_until_ready(small_policy_nn_forward(x, params))
    assert out.shape == (batch, out_size)
    # Exact divide in the softmax -> row sums hit 1.0 to f32 rounding.
    assert jnp.allclose(jnp.sum(out, axis=-1), 1.0, atol=1e-4)
    # bf16 MXU inputs -> loose tolerance vs. the f32 reference.
    assert jnp.allclose(out, _reference(x, params), atol=2e-2)

    # Exercise the multi-step grid + masked partial final block (20 rows, tile 16).
    k_x2 = jax.random.fold_in(k_x, 1)
    x2 = jax.random.normal(k_x2, (20, in_size), dtype=jnp.float32)
    out2 = jax.block_until_ready(small_policy_nn_forward(x2, params, block_batch=16))
    assert out2.shape == (20, out_size)
    assert jnp.allclose(jnp.sum(out2, axis=-1), 1.0, atol=1e-4)
    assert jnp.allclose(out2, _reference(x2, params), atol=2e-2)

    print("KERNEL_OK")
</pallas_src>

<mosaic_0001>
module attributes {stable_mosaic.version = 11 : i64} {
  func.func @_mlp_softmax_kernel(%arg0: i32, %arg1: memref<8x16xf32, #tpu.memory_space<vmem>>, %arg2: memref<16x64xbf16, #tpu.memory_space<vmem>>, %arg3: memref<1x64xf32, #tpu.memory_space<vmem>>, %arg4: memref<64x32xbf16, #tpu.memory_space<vmem>>, %arg5: memref<1x32xf32, #tpu.memory_space<vmem>>, %arg6: memref<32x4xbf16, #tpu.memory_space<vmem>>, %arg7: memref<1x4xf32, #tpu.memory_space<vmem>>, %arg8: memref<8x4xf32, #tpu.memory_space<vmem>>) attributes {dimension_semantics = [#tpu.dimension_semantics<parallel>], iteration_bounds = array<i64: 1>, scalar_prefetch = 0 : i64, scratch_operands = 0 : i64, tpu.core_type = #tpu.core_type<tc>, window_params = [{transform_indices = @transform_0, window_bounds = array<i64: 8, 16>}, {pipeline_mode = #tpu.pipeline_mode<synchronous>, transform_indices = @transform_1, window_bounds = array<i64: 16, 64>}, {pipeline_mode = #tpu.pipeline_mode<synchronous>, transform_indices = @transform_2, window_bounds = array<i64: 1, 64>}, {pipeline_mode = #tpu.pipeline_mode<synchronous>, transform_indices = @transform_3, window_bounds = array<i64: 64, 32>}, {pipeline_mode = #tpu.pipeline_mode<synchronous>, transform_indices = @transform_4, window_bounds = array<i64: 1, 32>}, {pipeline_mode = #tpu.pipeline_mode<synchronous>, transform_indices = @transform_5, window_bounds = array<i64: 32, 4>}, {pipeline_mode = #tpu.pipeline_mode<synchronous>, transform_indices = @transform_6, window_bounds = array<i64: 1, 4>}, {transform_indices = @transform_7, window_bounds = array<i64: 8, 4>}]} {
    %c0 = arith.constant 0 : index
    %c0_0 = arith.constant 0 : index
    %0 = vector.load %arg1[%c0, %c0_0] : memref<8x16xf32, #tpu.memory_space<vmem>>, vector<8x16xf32>
    %1 = arith.truncf %0 : vector<8x16xf32> to vector<8x16xbf16>
    %c0_1 = arith.constant 0 : index
    %c0_2 = arith.constant 0 : index
    %2 = vector.load %arg2[%c0_1, %c0_2] : memref<16x64xbf16, #tpu.memory_space<vmem>>, vector<16x64xbf16>
    %cst = arith.constant dense<0.000000e+00> : vector<8x64xf32>
    %3 = tpu.matmul %1, %2, %cst {dimension_numbers = #tpu.dot_dimension_numbers<[1], [0], [0], [1], [0, 0, 1, 1], [], []>} : vector<8x16xbf16>, vector<16x64xbf16>, vector<8x64xf32> -> vector<8x64xf32>
    %c0_3 = arith.constant 0 : index
    %c0_4 = arith.constant 0 : index
    %4 = vector.load %arg3[%c0_3, %c0_4] : memref<1x64xf32, #tpu.memory_space<vmem>>, vector<1x64xf32>
    %5 = vector.broadcast %4 : vector<1x64xf32> to vector<8x64xf32>
    %6 = arith.addf %3, %5 : vector<8x64xf32>
    %cst_5 = arith.constant 0.000000e+00 : f32
    %7 = vector.broadcast %cst_5 : f32 to vector<8x64xf32>
    %8 = arith.maximumf %6, %7 : vector<8x64xf32>
    %9 = arith.truncf %8 : vector<8x64xf32> to vector<8x64xbf16>
    %c0_6 = arith.constant 0 : index
    %c0_7 = arith.constant 0 : index
    %10 = vector.load %arg4[%c0_6, %c0_7] : memref<64x32xbf16, #tpu.memory_space<vmem>>, vector<64x32xbf16>
    %cst_8 = arith.constant dense<0.000000e+00> : vector<8x32xf32>
    %11 = tpu.matmul %9, %10, %cst_8 {dimension_numbers = #tpu.dot_dimension_numbers<[1], [0], [0], [1], [0, 0, 1, 1], [], []>} : vector<8x64xbf16>, vector<64x32xbf16>, vector<8x32xf32> -> vector<8x32xf32>
    %c0_9 = arith.constant 0 : index
    %c0_10 = arith.constant 0 : index
    %12 = vector.load %arg5[%c0_9, %c0_10] : memref<1x32xf32, #tpu.memory_space<vmem>>, vector<1x32xf32>
    %13 = vector.broadcast %12 : vector<1x32xf32> to vector<8x32xf32>
    %14 = arith.addf %11, %13 : vector<8x32xf32>
    %cst_11 = arith.constant 0.000000e+00 : f32
    %15 = vector.broadcast %cst_11 : f32 to vector<8x32xf32>
    %16 = arith.maximumf %14, %15 : vector<8x32xf32>
    %17 = arith.truncf %16 : vector<8x32xf32> to vector<8x32xbf16>
    %c0_12 = arith.constant 0 : index
    %c0_13 = arith.constant 0 : index
    %18 = vector.load %arg6[%c0_12, %c0_13] : memref<32x4xbf16, #tpu.memory_space<vmem>>, vector<32x4xbf16>
    %cst_14 = arith.constant dense<0.000000e+00> : vector<8x4xf32>
    %19 = tpu.matmul %17, %18, %cst_14 {dimension_numbers = #tpu.dot_dimension_numbers<[1], [0], [0], [1], [0, 0, 1, 1], [], []>} : vector<8x32xbf16>, vector<32x4xbf16>, vector<8x4xf32> -> vector<8x4xf32>
    %c0_15 = arith.constant 0 : index
    %c0_16 = arith.constant 0 : index
    %20 = vector.load %arg7[%c0_15, %c0_16] : memref<1x4xf32, #tpu.memory_space<vmem>>, vector<1x4xf32>
    %21 = vector.broadcast %20 : vector<1x4xf32> to vector<8x4xf32>
    %22 = arith.addf %19, %21 : vector<8x4xf32>
    %cst_17 = arith.constant dense<0xFF800000> : vector<8xf32>
    %23 = vector.multi_reduction <maximumf>, %22, %cst_17 [1] : vector<8x4xf32> to vector<8xf32>
    %24 = vector.shape_cast %23 : vector<8xf32> to vector<8x1xf32>
    %25 = vector.broadcast %24 : vector<8x1xf32> to vector<8x4xf32>
    %26 = arith.subf %22, %25 : vector<8x4xf32>
    %27 = math.exp %26 : vector<8x4xf32>
    %cst_18 = arith.constant dense<0.000000e+00> : vector<8xf32>
    %28 = vector.multi_reduction <add>, %27, %cst_18 [1] : vector<8x4xf32> to vector<8xf32>
    %29 = vector.shape_cast %28 : vector<8xf32> to vector<8x1xf32>
    %30 = vector.broadcast %29 : vector<8x1xf32> to vector<8x4xf32>
    %31 = arith.divf %27, %30 : vector<8x4xf32>
    %c0_19 = arith.constant 0 : index
    %c0_20 = arith.constant 0 : index
    %32 = vector.load %arg8[%c0_19, %c0_20] : memref<8x4xf32, #tpu.memory_space<vmem>>, vector<8x4xf32>
    tpu.vector_store %arg8[%c0_19, %c0_20], %31 {strides = array<i32>} : memref<8x4xf32, #tpu.memory_space<vmem>>, vector<8x4xf32>,
    return
  }
  func.func @transform_0(%arg0: i32) -> (i32, i32) {
    %c0_i32 = arith.constant 0 : i32
    %c0_i32_0 = arith.constant 0 : i32
    return %arg0, %c0_i32 : i32, i32
  }
  func.func @transform_1(%arg0: i32) -> (i32, i32) {
    %c0_i32 = arith.constant 0 : i32
    %c0_i32_0 = arith.constant 0 : i32
    %c0_i32_1 = arith.constant 0 : i32
    return %c0_i32, %c0_i32_0 : i32, i32
  }
  func.func @transform_2(%arg0: i32) -> (i32, i32) {
    %c0_i32 = arith.constant 0 : i32
    %c0_i32_0 = arith.constant 0 : i32
    %c0_i32_1 = arith.constant 0 : i32
    return %c0_i32, %c0_i32_0 : i32, i32
  }
  func.func @transform_3(%arg0: i32) -> (i32, i32) {
    %c0_i32 = arith.constant 0 : i32
    %c0_i32_0 = arith.constant 0 : i32
    %c0_i32_1 = arith.constant 0 : i32
    return %c0_i32, %c0_i32_0 : i32, i32
  }
  func.func @transform_4(%arg0: i32) -> (i32, i32) {
    %c0_i32 = arith.constant 0 : i32
    %c0_i32_0 = arith.constant 0 : i32
    %c0_i32_1 = arith.constant 0 : i32
    return %c0_i32, %c0_i32_0 : i32, i32
  }
  func.func @transform_5(%arg0: i32) -> (i32, i32) {
    %c0_i32 = arith.constant 0 : i32
    %c0_i32_0 = arith.constant 0 : i32
    %c0_i32_1 = arith.constant 0 : i32
    return %c0_i32, %c0_i32_0 : i32, i32
  }
  func.func @transform_6(%arg0: i32) -> (i32, i32) {
    %c0_i32 = arith.constant 0 : i32
    %c0_i32_0 = arith.constant 0 : i32
    %c0_i32_1 = arith.constant 0 : i32
    return %c0_i32, %c0_i32_0 : i32, i32
  }
  func.func @transform_7(%arg0: i32) -> (i32, i32) {
    %c0_i32 = arith.constant 0 : i32
    %c0_i32_0 = arith.constant 0 : i32
    return %arg0, %c0_i32 : i32, i32
  }
}

</mosaic_0001>

<bundles_post_ra>
// kernel: tpu_custom_call.1
= control target key start
LH: loop header
LB: loop body
LE: loop exit
PB: predicated region body
PF: predicated region fallthrough
CT: control target
= control target key end

     0   :  { %v321_v0 = vmov 0.0   ;;  %vm322_vm0 = vmmov 0   ;;  %vm44_vm1 = vcmask 130048   ;;  %vm129_vm2 = vcmask 523264   ;;  %s402_s1 = inlined_call_operand.vmem [shape: bf16[16,64], index: 1, kind: input, shape index: {}]   ;;  %s403_s0 = inlined_call_operand.vmem [shape: f32[8,16], index: 0, kind: input, shape index: {}]   ;;  %s404_s3 = inlined_call_operand.vmem [shape: bf16[64,32], index: 3, kind: input, shape index: {}]   ;;  %s405_s5 = inlined_call_operand.vmem [shape: bf16[32,4], index: 5, kind: input, shape index: {}]   ;;  %s406_s2 = inlined_call_operand.vmem [shape: f32[1,64], index: 2, kind: input, shape index: {}]   ;;  %s407_s4 = inlined_call_operand.vmem [shape: f32[1,32], index: 4, kind: input, shape index: {}]   ;;  %s408_s6 = inlined_call_operand.vmem [shape: f32[1,4], index: 6, kind: input, shape index: {}]   ;;  %s409_s7 = inlined_call_operand.vmem [shape: f32[8,4], index: 7, kind: output, shape index: {}]  }
   0x1   :  { %282 = vmatprep.subr.bf16.mxu0 %v321_v0  ;;  %v310_v1 = vld [vmem:[%s402_s1] sm:$0xff]   ;;  %284 = vmatprep.mubr.msk.bf16.mxu0 %vm322_vm0, %v321_v0  ;;  %v312_v5 = vld [vmem:[%s404_s3 + $0x8] sm:$0xff]   ;;  %v313_v6 = vld [vmem:[%s404_s3 + $0x10] sm:$0xff]   ;;  %vm198_vm3 = vcmask 261120   ;;  %vm242_vm4 = vcmask 31744  }
   0x2   :  { %v27_v2 = vld [vmem:[%s403_s0] sm:$0xff]  ;;  %288 = vmatprep.subr.bf16.mxu1 %v321_v0  ;;  %296 = vmatprep.mubr.msk.bf16.mxu1 %vm322_vm0, %v321_v0  ;;  %v314_v7 = vld [vmem:[%s404_s3 + $0x18] sm:$0xff]   ;;  %v316_v17 = vld [vmem:[%s405_s5 + $0x8] sm:$0xff]  }
   0x3   :  { %283 = vmatpush3.bf16.msra.mxu0 %v310_v1  ;;  %v28_v3 = vpack.c.bf16 %v27_v2, %v27_v2  ;;  %v311_v4 = vld [vmem:[%s404_s3] sm:$0xff]  }
   0x4   :  { %300 = vmatprep.subr.bf16.mxu0 %v321_v0  ;;  %289 = vmatpush3.bf16.msra.mxu1 %v311_v4  ;;  %v315_v8 = vld [vmem:[%s405_s5] sm:$0xff]  }
   0x5   :  { %290 = vmatprep.subr.bf16.mxu1 %v321_v0  ;;  %v259_v9 = vld [vmem:[%s406_s2] ss:$0 sm:$0xff] }
   0x6   :  { %285 = vmatmul.mubr.msk.bf16.vlgmr.msra.gmra.mrb[0].mxu0 %vm44_vm1, %v28_v3  ;;  %v262_v18 = vld [vmem:[%s407_s4] ss:$0 sm:$0xff] }
   0x7   :  { %304 = vmatprep.mubr.msk.bf16.mxu0 %vm322_vm0, %v321_v0  ;;  %301 = vmatpush3.bf16.msra.mxu0 %v315_v8  ;;  %v268_v26 = vld [vmem:[%s408_s6] ss:$0 sm:$0xff] }
   0x8   :  { %291 = vmatpush3.bf16.msra.mxu1 %v312_v5  ;;  %302 = vmatprep.subr.bf16.mxu0 %v321_v0 }
   0x9   :  { %292 = vmatprep.subr.bf16.mxu1 %v321_v0 }
   0xb   :  { %303 = vmatpush3.bf16.msra.mxu0 %v316_v17 }
   0xc   :  { %293 = vmatpush3.bf16.msra.mxu1 %v313_v6 }
   0xd   :  { %294 = vmatprep.subr.bf16.mxu1 %v321_v0 }
  0x10   :  { %295 = vmatpush3.bf16.msra.mxu1 %v314_v7 }
  0xd9   :  { %v82_v10 = vpop.f32.mrb[0].mxu0 }
  0xda   :  { %v83_v11 = vadd.f32 %v259_v9, %v82_v10  ;;  %v286_v12 = vpop.f32.mrb[1].mxu0 }
  0xdb   :  { %v85_v13 = vpop.f32.mrb[2].mxu0 }
  0xdc   :  { %v88_v14 = vmax.f32 %v83_v11, 0.0  ;;  %v287_v15 = vpop.f32.mrb[3].mxu0 }
  0xde   :  { %v89_v16 = vpack.c.bf16 %v88_v14, %v88_v14 }
  0xe0   :  { %297 = vmatmul.mubr.msk.bf16.vlgmr.msra.gmra.mrb[0].mxu1 %vm129_vm2, %v89_v16 }
 0x1b3   :  { %v167_v19 = vpop.f32.mrb[0].mxu1 }
 0x1b4   :  { %v168_v20 = vadd.f32 %v262_v18, %v167_v19  ;;  %v298_v21 = vpop.f32.mrb[1].mxu1 }
 0x1b5   :  { %v170_v22 = vpop.f32.mrb[2].mxu1 }
 0x1b6   :  { %v173_v23 = vmax.f32 %v168_v20, 0.0  ;;  %v299_v24 = vpop.f32.mrb[3].mxu1 }
 0x1b8   :  { %v174_v25 = vpack.c.bf16 %v173_v23, %v173_v23 }
 0x1ba   :  { %305 = vmatmul.mubr.msk.bf16.vlgmr.msra.gmra.mrb[4].mxu0 %vm198_vm3, %v174_v25 }
 0x28d   :  { %v236_v27 = vpop.f32.mrb[4].mxu0 }
 0x28e   :  { %v237_v28 = vadd.f32 %v268_v26, %v236_v27  ;;  %v306_v29 = vpop.f32.mrb[5].mxu0 }
 0x28f   :  { %v239_v30 = vpop.f32.mrb[6].mxu0 }
 0x290   :  { %v307_v31 = vpop.f32.mrb[7].mxu0  ;;  %v243_v32 = vsel %vm242_vm4, %v237_v28, -inf }
 0x291   :  { %244 = vmax.xlane.f32.xlu0 %v243_v32 }
 0x31e   :  { %v245_v33 = vpop.xlane.xlu0 %244 }
 0x31f   :  { %v246_v34 = vsub.f32 %v237_v28, %v245_v33 }
 0x321   :  { %v247_v35 = vmul.f32 1.442695, %v246_v34 }
 0x323   :  { %317 = vpow2.f32 %v247_v35 }
 0x32d   :  { %v318_v36 = vpop.eup %317 }
 0x32e   :  { %v249_v37 = vsel %vm242_vm4, %v318_v36, 0.0 }
 0x32f   :  { %250 = vadd.xlane.f32.xlu0 %v249_v37 }
 0x3bc   :  { %v251_v38 = vpop.xlane.xlu0 %250 }
 0x3bd   :  { %319 = vrcp.f32 %v251_v38 }
 0x3c7   :  { %v320_v39 = vpop.eup %319 }
 0x3c8   :  { %v253_v40 = vmul.f32 %v320_v39, %v318_v36 }
 0x3ca   :  { %254 = vst.msk [vmem:[%s409_s7] sm:$0xff] %vm242_vm4, %v253_v40 }

</bundles_post_ra>
